<compile_context>
chip_gen: v5e
topology: v5e:2x2
jax: 0.10.0
libtpu: 0.0.40
codegen_flags: <defaults>
</compile_context>

<pallas_src>
import math

import jax
import jax.numpy as jnp
from jax.experimental import pallas as pl
from jax.experimental.pallas import tpu as pltpu

_LANES = 128
_SUBLANES = 8
_TARGET_BLOCK_BYTES = 4 * 1024 * 1024        # ~4 MiB per VMEM-resident block
_SMALL_UNALIGNED_VMEM = 8 * 1024 * 1024      # whole-tensor-in-one-block cap
_SPLIT_THRESHOLD_BYTES = 2 * 1024 * 1024     # force >=2 blocks above this


def _round_up(v, m):
    return -(-v // m) * m


def _drop_path_kernel(scale_ref, x_ref, o_ref):
    # scale_ref: (Bt, 1[, 1]) f32 per-sample scale = floor(keep_prob + u) / keep_prob.
    # x_ref/o_ref: matching-rank tile of the flattened input / output.
    # Multiply in the input dtype (native bf16 on v6e/v7x; f32 cast is a no-op).
    o_ref[...] = x_ref[...] * scale_ref[...].astype(o_ref.dtype)


def _vmem_limit(block_vmem_bytes):
    # 2 pipelined buffers for x-in and x-out plus slack; stays < 64 MiB (v7x).
    return max(32 * 1024 * 1024, 5 * int(block_vmem_bytes))


def drop_path(x, key, drop_prob, training=True):
    """Pallas implementation of DropPath.forward (any shape, batch-first)."""
    if drop_prob == 0.0 or not training:
        return x
    keep_prob = 1.0 - float(drop_prob)

    B = x.shape[0]
    n = math.prod(x.shape[1:]) if x.ndim > 1 else 1
    dtype = x.dtype
    itemsize = jnp.dtype(dtype).itemsize
    total_bytes = B * n * itemsize

    # Per-sample scale (torch.rand equivalent), computed once in float32.
    u = jax.random.uniform(key, (B,), dtype=jnp.float32)
    scale = jnp.floor(keep_prob + u) * (1.0 / keep_prob)

    cost = pl.CostEstimate(
        flops=int(B * n),
        transcendentals=0,
        bytes_accessed=int(2 * total_bytes + 4 * B),
    )

    if n % _LANES == 0:
        # ---- lane/sublane-dense 3-D path: (B, R, 128), reshape is free ----
        R = n // _LANES
        flat = x.reshape(B, R, _LANES)
        scale_in = scale.reshape(B, 1, 1)

        # Rows per ~4 MiB block (multiple of 8 sublanes).
        target_rows = max(
            _SUBLANES,
            (_TARGET_BLOCK_BYTES // (_LANES * itemsize)) // _SUBLANES * _SUBLANES,
        )

        if R <= target_rows:
            # Small per-sample tail: pack several samples per block.
            Rt = R
            rows_vmem = _round_up(R, _SUBLANES)   # sublane-padded VMEM rows/sample
            Bt = min(B, max(1, target_rows // rows_vmem))
            if B >= 2 and B * rows_vmem * _LANES * itemsize > _SPLIT_THRESHOLD_BYTES:
                # Keep >=2 grid blocks so both v7x TensorCores get work.
                Bt = min(Bt, -(-B // 2))
            grid = (pl.cdiv(B, Bt), 1)
        else:
            # Large per-sample tail: one sample per block, tile the rows.
            Bt = 1
            Rt = target_rows
            grid = (B, pl.cdiv(R, Rt))

        block_vmem = Bt * _round_up(Rt, _SUBLANES) * _LANES * itemsize
        out = pl.pallas_call(
            _drop_path_kernel,
            out_shape=jax.ShapeDtypeStruct((B, R, _LANES), dtype),
            grid=grid,
            in_specs=[
                pl.BlockSpec((Bt, 1, 1), lambda b, r: (b, 0, 0)),        # scale f32
                pl.BlockSpec((Bt, Rt, _LANES), lambda b, r: (b, r, 0)),  # x tile
            ],
            out_specs=pl.BlockSpec((Bt, Rt, _LANES), lambda b, r: (b, r, 0)),
            compiler_params=pltpu.CompilerParams(
                dimension_semantics=("parallel", "parallel"),
                vmem_limit_bytes=_vmem_limit(block_vmem),
            ),
            cost_estimate=cost,
        )(scale_in, flat)
        return out.reshape(x.shape)

    # ---- ragged path: run directly on the unpadded (B, n) view (no jnp.pad,
    # ---- no slice-back; Pallas masks any partial boundary block) ----------
    flat = x.reshape(B, n)
    scale_in = scale.reshape(B, 1)

    whole_vmem = _round_up(B, _SUBLANES) * _round_up(n, _LANES) * itemsize
    if whole_vmem <= _SMALL_UNALIGNED_VMEM:
        # Tiny tensor: one block spanning the full (ragged) extents.
        Bt, Nt = B, n
        grid = (1, 1)
    else:
        # Tile the lane dim in 128-multiples; boundary block is masked.
        Bt = B if B < _SUBLANES else _SUBLANES
        rows_vmem = _round_up(Bt, _SUBLANES)
        Nt = max(
            _LANES,
            (_TARGET_BLOCK_BYTES // (rows_vmem * itemsize)) // _LANES * _LANES,
        )
        Nt = min(Nt, _round_up(n, _LANES))
        grid = (pl.cdiv(B, Bt), pl.cdiv(n, Nt))

    block_vmem = _round_up(Bt, _SUBLANES) * _round_up(Nt, _LANES) * itemsize
    out = pl.pallas_call(
        _drop_path_kernel,
        out_shape=jax.ShapeDtypeStruct((B, n), dtype),
        grid=grid,
        in_specs=[
            pl.BlockSpec((Bt, 1), lambda b, c: (b, 0)),    # scale f32
            pl.BlockSpec((Bt, Nt), lambda b, c: (b, c)),   # x tile
        ],
        out_specs=pl.BlockSpec((Bt, Nt), lambda b, c: (b, c)),
        compiler_params=pltpu.CompilerParams(
            dimension_semantics=("parallel", "parallel"),
            vmem_limit_bytes=_vmem_limit(block_vmem),
        ),
        cost_estimate=cost,
    )(scale_in, flat)
    return out.reshape(x.shape)


def _reference(x, key, drop_prob):
    """Pure-JAX mirror of the PyTorch forward (same RNG draw as the kernel)."""
    keep_prob = 1.0 - drop_prob
    u = jax.random.uniform(key, (x.shape[0],), dtype=jnp.float32)
    mask = jnp.floor(keep_prob + u).reshape((x.shape[0],) + (1,) * (x.ndim - 1))
    return (x / keep_prob) * mask.astype(x.dtype)


if __name__ == "__main__":
    key = jax.random.PRNGKey(0)
    k_x, k_m, k_x2, k_m2, k_x3, k_m3 = jax.random.split(key, 6)

    drop_prob = 0.2

    # Case 1: NCHW input matching the DaViT usage (tail is a multiple of 128).
    B, C, H, W = 2, 4, 16, 16
    x = jax.random.normal(k_x, (B, C, H, W), dtype=jnp.float32)
    out = jax.block_until_ready(drop_path(x, k_m, drop_prob, training=True))
    ref = _reference(x, k_m, drop_prob)
    assert jnp.allclose(out, ref, atol=1e-5, rtol=1e-5), "mismatch vs reference (case 1)"

    # Case 2: arbitrary shape whose tail is NOT a multiple of 128 (ragged path,
    # no padding round-trip).
    x2 = jax.random.normal(k_x2, (3, 5, 7, 9), dtype=jnp.float32)
    out2 = jax.block_until_ready(drop_path(x2, k_m2, drop_prob, training=True))
    ref2 = _reference(x2, k_m2, drop_prob)
    assert jnp.allclose(out2, ref2, atol=1e-5, rtol=1e-5), "mismatch vs reference (case 2)"

    # Case 3: odd batch large enough to force a cdiv grid with a masked
    # partial boundary block on the batch axis.
    x3 = jax.random.normal(k_x3, (3, 8, 176, 128), dtype=jnp.float32)
    out3 = jax.block_until_ready(drop_path(x3, k_m3, drop_prob, training=True))
    ref3 = _reference(x3, k_m3, drop_prob)
    assert jnp.allclose(out3, ref3, atol=1e-5, rtol=1e-5), "mismatch vs reference (case 3)"

    # Eval / drop_prob == 0 paths are identity.
    assert jnp.array_equal(drop_path(x, k_m, drop_prob, training=False), x)
    assert jnp.array_equal(drop_path(x, k_m, 0.0, training=True), x)

    print("KERNEL_OK")
</pallas_src>

<mosaic_0001>
module attributes {stable_mosaic.version = 11 : i64} {
  func.func @_drop_path_kernel(%arg0: i32, %arg1: i32, %arg2: memref<2x1x1xf32, #tpu.memory_space<vmem>>, %arg3: memref<2x8x128xf32, #tpu.memory_space<vmem>>, %arg4: memref<2x8x128xf32, #tpu.memory_space<vmem>>) attributes {dimension_semantics = [#tpu.dimension_semantics<parallel>, #tpu.dimension_semantics<parallel>], iteration_bounds = array<i64: 1, 1>, scalar_prefetch = 0 : i64, scratch_operands = 0 : i64, tpu.core_type = #tpu.core_type<tc>, window_params = [{transform_indices = @transform_0, window_bounds = array<i64: 2, 1, 1>}, {transform_indices = @transform_1, window_bounds = array<i64: 2, 8, 128>}, {transform_indices = @transform_2, window_bounds = array<i64: 2, 8, 128>}]} {
    %c0 = arith.constant 0 : index
    %c0_0 = arith.constant 0 : index
    %c0_1 = arith.constant 0 : index
    %0 = vector.load %arg3[%c0, %c0_0, %c0_1] : memref<2x8x128xf32, #tpu.memory_space<vmem>>, vector<2x8x128xf32>
    %c0_2 = arith.constant 0 : index
    %c0_3 = arith.constant 0 : index
    %c0_4 = arith.constant 0 : index
    %1 = vector.load %arg2[%c0_2, %c0_3, %c0_4] : memref<2x1x1xf32, #tpu.memory_space<vmem>>, vector<2x1x1xf32>
    %2 = vector.broadcast %1 : vector<2x1x1xf32> to vector<2x8x128xf32>
    %3 = arith.mulf %0, %2 : vector<2x8x128xf32>
    %c0_5 = arith.constant 0 : index
    %c0_6 = arith.constant 0 : index
    %c0_7 = arith.constant 0 : index
    %4 = vector.load %arg4[%c0_5, %c0_6, %c0_7] : memref<2x8x128xf32, #tpu.memory_space<vmem>>, vector<2x8x128xf32>
    tpu.vector_store %arg4[%c0_5, %c0_6, %c0_7], %3 {strides = array<i32>} : memref<2x8x128xf32, #tpu.memory_space<vmem>>, vector<2x8x128xf32>,
    return
  }
  func.func @transform_0(%arg0: i32, %arg1: i32) -> (i32, i32, i32) {
    %c0_i32 = arith.constant 0 : i32
    %c0_i32_0 = arith.constant 0 : i32
    %c0_i32_1 = arith.constant 0 : i32
    return %arg0, %c0_i32, %c0_i32_0 : i32, i32, i32
  }
  func.func @transform_1(%arg0: i32, %arg1: i32) -> (i32, i32, i32) {
    %c0_i32 = arith.constant 0 : i32
    %c0_i32_0 = arith.constant 0 : i32
    return %arg0, %arg1, %c0_i32 : i32, i32, i32
  }
  func.func @transform_2(%arg0: i32, %arg1: i32) -> (i32, i32, i32) {
    %c0_i32 = arith.constant 0 : i32
    %c0_i32_0 = arith.constant 0 : i32
    return %arg0, %arg1, %c0_i32 : i32, i32, i32
  }
}

</mosaic_0001>

<bundles_post_ra>
// kernel: tpu_custom_call.1
= control target key start
LH: loop header
LB: loop body
LE: loop exit
PB: predicated region body
PF: predicated region fallthrough
CT: control target
= control target key end

     0   :  { %7 = vsyncpa [#allocation3], 0  ;;  %s159_s0 = inlined_call_operand.vmem [shape: f32[2,1,1], index: 0, kind: input, shape index: {}]   ;;  %s160_s1 = inlined_call_operand.hbm [shape: f32[2,8,128], index: 1, kind: input, shape index: {}]   ;;  %s161_s2 = inlined_call_operand.hbm [shape: f32[2,8,128], index: 2, kind: output, shape index: {}]  }
   0x1   :  { %8 = vsyncpa [#allocation4], 0  ;;  %s15_s11 = sshll.u32 %s160_s1, 4  ;;  %s127_s12 = smov [#allocation2]   ;;  %s16_s11 = int_to_ptr.hbm [resolvable:$true] %s15_s11 }
   0x2   :  { %s17_s13 = sshll.u32 %s127_s12, 4  ;;  %s128_s14 = smov 128   ;;  %s18_s13 = int_to_ptr.vmem [resolvable:$true] %s17_s13 }
   0x3   :  { %s129_s15 = smov 8  }
   0x4   :  { %23 = dma.hbm_to_vmem [thread:$0]  %s16_s11, 256, %s18_s13, [#allocation3], %s128_s14, %s128_s14, %s129_s15  }
   0x5   :  { %123 = dma.done.wait [#allocation3], 256  }
   0x6   :  { %124 = vsyncadd [#allocation3], 4294967040  ;;  %v130_v0 = vmov 0   ;;  %v73_v1 = vld [vmem:[%s159_s0] ss:$0 sm:$0xff]  ;;  %v29_v6 = vld [vmem:[#allocation2 + $0x8] sm:$0xff] }
   0x7   :  { %72 = vset.pattern.permute.xlu0 %v130_v0  ;;  %v74_v2 = vld [vmem:[%s159_s0 + $0x1] ss:$0 sm:$0xff]  ;;  %s131_s1 = smov [#allocation5]   ;;  %s54_s23 = sshll.u32 %s161_s2, 4  ;;  %s55_s23 = int_to_ptr.hbm [resolvable:$true] %s54_s23 }
   0x8   :  { %37 = vperm.xlu0 %72, %v73_v1   ;;  %v28_v3 = vld [vmem:[#allocation2] sm:$0xff]  ;;  %s52_s20 = sshll.u32 %s131_s1, 4  ;;  %s53_s20 = int_to_ptr.vmem [resolvable:$true] %s52_s20 }
  0x10   :  { %41 = vperm.xlu0 %72, %v74_v2  }
  0x7a   :  { %v38_v4 = vpop.permute.xlu0 %37 }
  0x7b   :  { %v44_v5 = vmul.f32 %v38_v4, %v28_v3 }
  0x7d   :  { %46 = vst [vmem:[#allocation5] sm:$0xff] %v44_v5 }
  0x82   :  { %v42_v7 = vpop.permute.xlu0 %41 }
  0x83   :  { %v45_v8 = vmul.f32 %v42_v7, %v29_v6 }
  0x85   :  { %47 = vst [vmem:[#allocation5 + $0x8] sm:$0xff] %v45_v8 }
  0x86   :  { %60 = dma.vmem_to_hbm [thread:$0]  %s53_s20, 256, %s55_s23, [#allocation4], %s128_s14, %s128_s14, %s129_s15  }
  0x87   :  { %125 = dma.done.wait [#allocation4], 256  }
  0x88   :  { %126 = vsyncadd [#allocation4], 4294967040 }
  0x89   :  { %65 = vsyncpa [#allocation3], 1 }
  0x8a   :  { %66 = vsyncpa [#allocation4], 1 }

</bundles_post_ra>
